<compile_context>
chip_gen: v7x
topology: tpu7x:2x2x1
jax: 0.10.0
libtpu: 0.0.40
codegen_flags: <defaults>
</compile_context>

<pallas_src>
import functools

import jax
import jax.numpy as jnp
from jax.experimental import pallas as pl
from jax.experimental.pallas import tpu as pltpu

LANES = 128
MAX_TILE_ROWS = 4096                 # (4096, 128) f32 block = 2 MiB
VMEM_LIMIT_BYTES = 48 * 1024 * 1024  # headroom for block buffers + temporaries

# int8 label encoding produced by the wrapper.
_ENC_POS = 0     # original label 0   ("no-change", remapped to +1)
_ENC_NEG = 1     # original label 1   ("change",    remapped to -1)
_ENC_IGN = 2     # original label 255 (ignore)
_ENC_OTHER = 3   # anything else: contributes nothing


def _bcl_kernel(d_ref, l_ref, out_ref, *, margin, n, tile_rows, inner_steps):
    p = pl.program_id(0)   # parallel part (TensorCore split on v7x)
    k = pl.program_id(1)   # reduction step within the part

    @pl.when(k == 0)
    def _():
        out_ref[...] = jnp.zeros_like(out_ref)

    # Global flat index of every element of this (logical) block.  Masks out
    # (a) tail padding to a lane multiple, (b) the out-of-bounds region of the
    # partial last block and (c) clamped overflow steps of the parallel split.
    logical_block = p * inner_steps + k
    base = logical_block * (tile_rows * LANES)
    row_i = jax.lax.broadcasted_iota(jnp.int32, (tile_rows, LANES), 0)
    lane_i = jax.lax.broadcasted_iota(jnp.int32, (tile_rows, LANES), 1)
    valid = (base + row_i * LANES + lane_i) < n

    lab = l_ref[...].astype(jnp.int32)
    dist = d_ref[...]

    pos_m = valid & (lab == _ENC_POS)
    neg_m = valid & (lab == _ENC_NEG)
    ign_m = valid & (lab == _ENC_IGN)

    zero = jnp.float32(0.0)
    one = jnp.float32(1.0)

    # loss_1 numerator: (1 + remapped)/2 * dist^2  ->  dist^2 on pos pixels.
    t1 = jnp.where(pos_m, dist * dist, zero)

    # loss_2 numerator: (1 - remapped)/2 * clamp(margin - masked_dist, 0)^2
    #   neg pixels:    clamp(margin - dist, 0)^2
    #   ignore pixels: distance is masked to 0 but the (1-255)/2 weight still
    #                  applies -> constant -127 * max(margin, 0)^2 each
    #                  (kept to match the reference module exactly).
    c = jnp.maximum(jnp.float32(margin) - dist, zero)
    ign_w = jnp.float32((1.0 - 255.0) / 2.0 * max(float(margin), 0.0) ** 2)
    t2 = jnp.where(neg_m, c * c, jnp.where(ign_m, ign_w, zero))

    # Per-lane partial sums only (VALU work in steady state); the cross-lane
    # reduce and final divides happen once in JAX on the tiny output.
    out_ref[0, 0, :] += jnp.sum(jnp.where(pos_m, one, zero), axis=0)
    out_ref[0, 1, :] += jnp.sum(jnp.where(neg_m, one, zero), axis=0)
    out_ref[0, 2, :] += jnp.sum(t1, axis=0)
    out_ref[0, 3, :] += jnp.sum(t2, axis=0)


def bcl_loss(distance, label, margin=2.0):
    """Batch-balanced contrastive loss forward, matching the PyTorch BCL module.

    Assumes integer-valued labels; values other than {0, 1, 255} contribute
    nothing to the loss (the reference module only ever sees those values).
    """
    d = distance.reshape(-1).astype(jnp.float32)
    l = label.reshape(-1)
    # Compact int8 label stream: 4x less HBM traffic than an f32 label.
    l_enc = jnp.where(
        l == 0, _ENC_POS,
        jnp.where(l == 1, _ENC_NEG,
                  jnp.where(l == 255, _ENC_IGN, _ENC_OTHER))).astype(jnp.int8)

    n = d.shape[0]
    n128 = ((n + LANES - 1) // LANES) * LANES
    if n128 != n:  # pad only to the next lane multiple (tiny; often a no-op)
        d = jnp.pad(d, (0, n128 - n))
        l_enc = jnp.pad(l_enc, (0, n128 - n), constant_values=_ENC_OTHER)
    rows = n128 // LANES
    d2 = d.reshape(rows, LANES)
    l2 = l_enc.reshape(rows, LANES)

    if rows <= MAX_TILE_ROWS:
        tile_rows = rows              # single full-array block (always legal)
        num_blocks = 1
    else:
        tile_rows = MAX_TILE_ROWS
        num_blocks = (rows + tile_rows - 1) // tile_rows

    # Leading "parallel" axis: on v7x each TensorCore reduces half the blocks
    # into its own partial accumulator; harmless (sequential) on 1-TC chips.
    num_parts = 2 if num_blocks >= 2 else 1
    inner_steps = (num_blocks + num_parts - 1) // num_parts

    if num_parts * inner_steps == num_blocks:
        in_map = lambda p, k: (p * inner_steps + k, 0)
    else:
        # Clamp the (at most one) overflow step onto the last real block; the
        # in-kernel validity mask zeroes its contribution.
        in_map = lambda p, k: (jnp.minimum(p * inner_steps + k, num_blocks - 1), 0)

    tile_spec = pl.BlockSpec((tile_rows, LANES), in_map)

    partials = pl.pallas_call(
        functools.partial(
            _bcl_kernel, margin=float(margin), n=n,
            tile_rows=tile_rows, inner_steps=inner_steps),
        out_shape=jax.ShapeDtypeStruct((num_parts, 4, LANES), jnp.float32),
        grid=(num_parts, inner_steps),
        in_specs=[tile_spec, tile_spec],
        out_specs=pl.BlockSpec((1, 4, LANES), lambda p, k: (p, 0, 0)),
        compiler_params=pltpu.CompilerParams(
            dimension_semantics=("parallel", "arbitrary"),
            vmem_limit_bytes=VMEM_LIMIT_BYTES),
    )(d2, l2)

    tot = jnp.sum(partials, axis=(0, 2))     # [pos_cnt, neg_cnt, s1, s2]
    pos_num = tot[0] + 0.0001
    neg_num = tot[1] + 0.0001
    return tot[2] / pos_num + tot[3] / neg_num


def bcl_ref(distance, label, margin=2.0):
    # Pure-JAX reference matching the PyTorch forward exactly.
    label = label.astype(jnp.float32)
    label = jnp.where(label == 1.0, -1.0, jnp.where(label == 0.0, 1.0, label))
    mask = (label != 255.0).astype(jnp.float32)
    distance = distance.astype(jnp.float32) * mask
    pos_num = jnp.sum((label == 1.0).astype(jnp.float32)) + 0.0001
    neg_num = jnp.sum((label == -1.0).astype(jnp.float32)) + 0.0001
    loss_1 = jnp.sum((1.0 + label) / 2.0 * distance ** 2) / pos_num
    loss_2 = jnp.sum(
        (1.0 - label) / 2.0 * jnp.maximum(margin - distance, 0.0) ** 2) / neg_num
    return loss_1 + loss_2


if __name__ == "__main__":
    key = jax.random.PRNGKey(0)
    k1, k2, k3, k4 = jax.random.split(key, 4)

    # Small case: single block, no padding. (float labels, as in the module)
    B, H, W = 2, 16, 16
    distance = jax.random.uniform(k1, (B, H, W), jnp.float32, 0.0, 3.0)
    label = jax.random.choice(
        k2, jnp.array([0.0, 1.0, 255.0], jnp.float32), shape=(B, H, W))
    loss = jax.block_until_ready(bcl_loss(distance, label, margin=2.0))
    ref = bcl_ref(distance, label, margin=2.0)
    assert jnp.allclose(loss, ref, rtol=1e-5, atol=1e-5), (loss, ref)

    # Multi-block case: exercises tiling, the 2-way parallel split, the
    # partially out-of-bounds last block and the clamped overflow step.
    B2, H2, W2 = 16, 256, 260
    distance2 = jax.random.uniform(k3, (B2, H2, W2), jnp.float32, 0.0, 3.0)
    label2 = jax.random.choice(
        k4, jnp.array([0, 1, 255], jnp.int32), shape=(B2, H2, W2))
    loss2 = jax.block_until_ready(bcl_loss(distance2, label2, margin=2.0))
    ref2 = bcl_ref(distance2, label2, margin=2.0)
    assert jnp.allclose(loss2, ref2, rtol=1e-3, atol=1e-3), (loss2, ref2)

    print("KERNEL_OK")
</pallas_src>

<mosaic_0001>
module attributes {stable_mosaic.version = 11 : i64} {
  func.func @_bcl_kernel(%arg0: i32, %arg1: i32, %arg2: memref<4x128xf32, #tpu.memory_space<vmem>>, %arg3: memref<4x128xi8, #tpu.memory_space<vmem>>, %arg4: memref<1x4x128xf32, #tpu.memory_space<vmem>>) attributes {dimension_semantics = [#tpu.dimension_semantics<parallel>, #tpu.dimension_semantics<arbitrary>], iteration_bounds = array<i64: 1, 1>, scalar_prefetch = 0 : i64, scratch_operands = 0 : i64, tpu.core_type = #tpu.core_type<tc>, window_params = [{transform_indices = @transform_0, window_bounds = array<i64: 4, 128>}, {transform_indices = @transform_1, window_bounds = array<i64: 4, 128>}, {transform_indices = @transform_2, window_bounds = array<i64: 1, 4, 128>}]} {
    %c0_i32 = arith.constant 0 : i32
    %0 = arith.cmpi eq, %arg1, %c0_i32 : i32
    %1 = arith.extui %0 : i1 to i32
    %c0_i32_0 = arith.constant 0 : i32
    %2 = arith.cmpi ne, %1, %c0_i32_0 : i32
    scf.if %2 {
      %cst_40 = arith.constant 0.000000e+00 : f32
      %73 = vector.broadcast %cst_40 : f32 to vector<1x4x128xf32>
      %c0_41 = arith.constant 0 : index
      %c0_42 = arith.constant 0 : index
      %c0_43 = arith.constant 0 : index
      %74 = vector.load %arg4[%c0_41, %c0_42, %c0_43] : memref<1x4x128xf32, #tpu.memory_space<vmem>>, vector<1x4x128xf32>
      tpu.vector_store %arg4[%c0_41, %c0_42, %c0_43], %73 {strides = array<i32>} : memref<1x4x128xf32, #tpu.memory_space<vmem>>, vector<1x4x128xf32>,
    } else {
    }
    %c1_i32 = arith.constant 1 : i32
    %3 = arith.muli %arg0, %c1_i32 : i32
    %4 = arith.addi %3, %arg1 : i32
    %c512_i32 = arith.constant 512 : i32
    %5 = arith.muli %4, %c512_i32 : i32
    %6 = tpu.iota {dimensions = array<i32: 0>} : vector<4x128xi32>
    %7 = tpu.iota {dimensions = array<i32: 1>} : vector<4x128xi32>
    %c128_i32 = arith.constant 128 : i32
    %8 = vector.broadcast %c128_i32 : i32 to vector<4x128xi32>
    %9 = arith.muli %6, %8 : vector<4x128xi32>
    %10 = vector.broadcast %5 : i32 to vector<4x128xi32>
    %11 = arith.addi %10, %9 : vector<4x128xi32>
    %12 = arith.addi %11, %7 : vector<4x128xi32>
    %c512_i32_1 = arith.constant 512 : i32
    %13 = vector.broadcast %c512_i32_1 : i32 to vector<4x128xi32>
    %14 = arith.cmpi slt, %12, %13 : vector<4x128xi32>
    %c0 = arith.constant 0 : index
    %c0_2 = arith.constant 0 : index
    %15 = vector.load %arg3[%c0, %c0_2] : memref<4x128xi8, #tpu.memory_space<vmem>>, vector<4x128xi8>
    %16 = arith.extsi %15 : vector<4x128xi8> to vector<4x128xi32>
    %c0_3 = arith.constant 0 : index
    %c0_4 = arith.constant 0 : index
    %17 = vector.load %arg2[%c0_3, %c0_4] : memref<4x128xf32, #tpu.memory_space<vmem>>, vector<4x128xf32>
    %c0_i32_5 = arith.constant 0 : i32
    %18 = vector.broadcast %c0_i32_5 : i32 to vector<4x128xi32>
    %19 = arith.cmpi eq, %16, %18 : vector<4x128xi32>
    %20 = arith.andi %14, %19 : vector<4x128xi1>
    %c1_i32_6 = arith.constant 1 : i32
    %21 = vector.broadcast %c1_i32_6 : i32 to vector<4x128xi32>
    %22 = arith.cmpi eq, %16, %21 : vector<4x128xi32>
    %23 = arith.andi %14, %22 : vector<4x128xi1>
    %c2_i32 = arith.constant 2 : i32
    %24 = vector.broadcast %c2_i32 : i32 to vector<4x128xi32>
    %25 = arith.cmpi eq, %16, %24 : vector<4x128xi32>
    %26 = arith.andi %14, %25 : vector<4x128xi1>
    %27 = arith.mulf %17, %17 : vector<4x128xf32>
    %cst = arith.constant 0.000000e+00 : f32
    %28 = vector.broadcast %cst : f32 to vector<4x128xf32>
    %29 = arith.select %20, %27, %28 : vector<4x128xi1>, vector<4x128xf32>
    %cst_7 = arith.constant 2.000000e+00 : f32
    %30 = vector.broadcast %cst_7 : f32 to vector<4x128xf32>
    %31 = arith.subf %30, %17 : vector<4x128xf32>
    %cst_8 = arith.constant 0.000000e+00 : f32
    %32 = vector.broadcast %cst_8 : f32 to vector<4x128xf32>
    %33 = arith.maximumf %31, %32 : vector<4x128xf32>
    %34 = arith.mulf %33, %33 : vector<4x128xf32>
    %cst_9 = arith.constant -5.080000e+02 : f32
    %cst_10 = arith.constant 0.000000e+00 : f32
    %35 = vector.broadcast %cst_9 : f32 to vector<4x128xf32>
    %36 = vector.broadcast %cst_10 : f32 to vector<4x128xf32>
    %37 = arith.select %26, %35, %36 : vector<4x128xi1>, vector<4x128xf32>
    %38 = arith.select %23, %34, %37 : vector<4x128xi1>, vector<4x128xf32>
    %c0_11 = arith.constant 0 : index
    %c0_12 = arith.constant 0 : index
    %c0_13 = arith.constant 0 : index
    %39 = vector.load %arg4[%c0_11, %c0_12, %c0_13] : memref<1x4x128xf32, #tpu.memory_space<vmem>>, vector<1x1x128xf32>
    %40 = vector.shape_cast %39 : vector<1x1x128xf32> to vector<128xf32>
    %cst_14 = arith.constant 1.000000e+00 : f32
    %cst_15 = arith.constant 0.000000e+00 : f32
    %41 = vector.broadcast %cst_14 : f32 to vector<4x128xf32>
    %42 = vector.broadcast %cst_15 : f32 to vector<4x128xf32>
    %43 = arith.select %20, %41, %42 : vector<4x128xi1>, vector<4x128xf32>
    %cst_16 = arith.constant dense<0.000000e+00> : vector<128xf32>
    %44 = vector.multi_reduction <add>, %43, %cst_16 [0] : vector<4x128xf32> to vector<128xf32>
    %45 = arith.addf %40, %44 : vector<128xf32>
    %c0_17 = arith.constant 0 : index
    %c0_18 = arith.constant 0 : index
    %c0_19 = arith.constant 0 : index
    %46 = vector.load %arg4[%c0_17, %c0_18, %c0_19] : memref<1x4x128xf32, #tpu.memory_space<vmem>>, vector<1x1x128xf32>
    %47 = vector.shape_cast %46 : vector<1x1x128xf32> to vector<128xf32>
    %48 = vector.shape_cast %45 : vector<128xf32> to vector<1x1x128xf32>
    tpu.vector_store %arg4[%c0_17, %c0_18, %c0_19], %48 {strides = array<i32>} : memref<1x4x128xf32, #tpu.memory_space<vmem>>, vector<1x1x128xf32>,
    %c0_20 = arith.constant 0 : index
    %c1 = arith.constant 1 : index
    %c0_21 = arith.constant 0 : index
    %49 = vector.load %arg4[%c0_20, %c1, %c0_21] : memref<1x4x128xf32, #tpu.memory_space<vmem>>, vector<1x1x128xf32>
    %50 = vector.shape_cast %49 : vector<1x1x128xf32> to vector<128xf32>
    %cst_22 = arith.constant 1.000000e+00 : f32
    %cst_23 = arith.constant 0.000000e+00 : f32
    %51 = vector.broadcast %cst_22 : f32 to vector<4x128xf32>
    %52 = vector.broadcast %cst_23 : f32 to vector<4x128xf32>
    %53 = arith.select %23, %51, %52 : vector<4x128xi1>, vector<4x128xf32>
    %cst_24 = arith.constant dense<0.000000e+00> : vector<128xf32>
    %54 = vector.multi_reduction <add>, %53, %cst_24 [0] : vector<4x128xf32> to vector<128xf32>
    %55 = arith.addf %50, %54 : vector<128xf32>
    %c0_25 = arith.constant 0 : index
    %c1_26 = arith.constant 1 : index
    %c0_27 = arith.constant 0 : index
    %56 = vector.load %arg4[%c0_25, %c1_26, %c0_27] : memref<1x4x128xf32, #tpu.memory_space<vmem>>, vector<1x1x128xf32>
    %57 = vector.shape_cast %56 : vector<1x1x128xf32> to vector<128xf32>
    %58 = vector.shape_cast %55 : vector<128xf32> to vector<1x1x128xf32>
    tpu.vector_store %arg4[%c0_25, %c1_26, %c0_27], %58 {strides = array<i32>} : memref<1x4x128xf32, #tpu.memory_space<vmem>>, vector<1x1x128xf32>,
    %c0_28 = arith.constant 0 : index
    %c2 = arith.constant 2 : index
    %c0_29 = arith.constant 0 : index
    %59 = vector.load %arg4[%c0_28, %c2, %c0_29] : memref<1x4x128xf32, #tpu.memory_space<vmem>>, vector<1x1x128xf32>
    %60 = vector.shape_cast %59 : vector<1x1x128xf32> to vector<128xf32>
    %cst_30 = arith.constant dense<0.000000e+00> : vector<128xf32>
    %61 = vector.multi_reduction <add>, %29, %cst_30 [0] : vector<4x128xf32> to vector<128xf32>
    %62 = arith.addf %60, %61 : vector<128xf32>
    %c0_31 = arith.constant 0 : index
    %c2_32 = arith.constant 2 : index
    %c0_33 = arith.constant 0 : index
    %63 = vector.load %arg4[%c0_31, %c2_32, %c0_33] : memref<1x4x128xf32, #tpu.memory_space<vmem>>, vector<1x1x128xf32>
    %64 = vector.shape_cast %63 : vector<1x1x128xf32> to vector<128xf32>
    %65 = vector.shape_cast %62 : vector<128xf32> to vector<1x1x128xf32>
    tpu.vector_store %arg4[%c0_31, %c2_32, %c0_33], %65 {strides = array<i32>} : memref<1x4x128xf32, #tpu.memory_space<vmem>>, vector<1x1x128xf32>,
    %c0_34 = arith.constant 0 : index
    %c3 = arith.constant 3 : index
    %c0_35 = arith.constant 0 : index
    %66 = vector.load %arg4[%c0_34, %c3, %c0_35] : memref<1x4x128xf32, #tpu.memory_space<vmem>>, vector<1x1x128xf32>
    %67 = vector.shape_cast %66 : vector<1x1x128xf32> to vector<128xf32>
    %cst_36 = arith.constant dense<0.000000e+00> : vector<128xf32>
    %68 = vector.multi_reduction <add>, %38, %cst_36 [0] : vector<4x128xf32> to vector<128xf32>
    %69 = arith.addf %67, %68 : vector<128xf32>
    %c0_37 = arith.constant 0 : index
    %c3_38 = arith.constant 3 : index
    %c0_39 = arith.constant 0 : index
    %70 = vector.load %arg4[%c0_37, %c3_38, %c0_39] : memref<1x4x128xf32, #tpu.memory_space<vmem>>, vector<1x1x128xf32>
    %71 = vector.shape_cast %70 : vector<1x1x128xf32> to vector<128xf32>
    %72 = vector.shape_cast %69 : vector<128xf32> to vector<1x1x128xf32>
    tpu.vector_store %arg4[%c0_37, %c3_38, %c0_39], %72 {strides = array<i32>} : memref<1x4x128xf32, #tpu.memory_space<vmem>>, vector<1x1x128xf32>,
    return
  }
  func.func @transform_0(%arg0: i32, %arg1: i32) -> (i32, i32) {
    %c1_i32 = arith.constant 1 : i32
    %0 = arith.muli %arg0, %c1_i32 : i32
    %1 = arith.addi %0, %arg1 : i32
    %c0_i32 = arith.constant 0 : i32
    %c0_i32_0 = arith.constant 0 : i32
    return %1, %c0_i32 : i32, i32
  }
  func.func @transform_1(%arg0: i32, %arg1: i32) -> (i32, i32) {
    %c1_i32 = arith.constant 1 : i32
    %0 = arith.muli %arg0, %c1_i32 : i32
    %1 = arith.addi %0, %arg1 : i32
    %c0_i32 = arith.constant 0 : i32
    %c0_i32_0 = arith.constant 0 : i32
    return %1, %c0_i32 : i32, i32
  }
  func.func @transform_2(%arg0: i32, %arg1: i32) -> (i32, i32, i32) {
    %c0_i32 = arith.constant 0 : i32
    %c0_i32_0 = arith.constant 0 : i32
    %c0_i32_1 = arith.constant 0 : i32
    return %arg0, %c0_i32, %c0_i32_0 : i32, i32, i32
  }
}

</mosaic_0001>

<bundles_post_ra>
// kernel: tpu_custom_call.1
= control target key start
LH: loop header
LB: loop body
LE: loop exit
PB: predicated region body
PF: predicated region fallthrough
CT: control target
= control target key end

     0   :  { %7 = vsyncpa [#allocation3], 0  ;;  %s243_s0 = inlined_call_operand.hbm [shape: f32[4,128], index: 0, kind: input, shape index: {}]   ;;  %s244_s1 = inlined_call_operand.vmem [shape: s8[4,128], index: 1, kind: input, shape index: {}]   ;;  %s245_s2 = inlined_call_operand.hbm [shape: f32[1,4,128], index: 2, kind: output, shape index: {}]  }
   0x1   :  { %8 = vsyncpa [#allocation4], 0  ;;  %s186_s9 = smov [#allocation2]   ;;  %s138_s13 = scalar_lea.hbm %s243_s0, 64 }
   0x2   :  { %s18_s10 = sshll.u32 %s186_s9, 4  ;;  %p139_p0 = scmp.ne.s32.totalorder %s243_s0, %s138_s13  ;;  %s19_s10 = int_to_ptr.vmem [resolvable:$true] %s18_s10 }
   0x3   :  { %p142_p1 = scmp.lt.u32.totalorder %s138_s13, %s243_s0 }
   0x5   :  { %p144_p2 = pnand %p142_p1, %p139_p0 }
   0x7   :  { %147 = shalt.err (!%p144_p2)
}
   0x8   :  { %s148_s18 = scalar_lea.vmem %s19_s10, 64  ;;  %p153_p4 = scmp.lt.s32.totalorder %s19_s10, %s19_s10 }
   0x9   :  { %p149_p3 = scmp.ne.s32.totalorder %s19_s10, %s148_s18  ;;  %p154_p5 = scmp.lt.s32.totalorder %s148_s18, %s148_s18 }
   0xb   :  { %p155_p6 = por %p154_p5, %p153_p4 }
   0xd   :  { %p156_p7 = pnand %p155_p6, %p149_p3 }
   0xf   :  { %159 = shalt.err (!%p156_p7)
}
  0x10   :  { %21 = dma.hbm_to_vmem [thread:$0]  %s243_s0, 64, %s19_s10, [#allocation3]  }
  0x11   :  { %182 = dma.done.wait [#allocation3], 64  }
  0x12   :  { %183 = vsyncadd [#allocation3], 4294967232  ;;  %v49_v0 = vlaneseq  ;;  %v187_v1 = vmov 0.0   ;;  %v58_v6 = vld [vmem:[%s244_s1] sm:$0x1]  ;;  %vm76_vm1 = vcmask 1043456  }
  0x13   :  { %46 = vst [vmem:[#allocation5] sm:$0xf] %v187_v1  ;;  %v60_v7 = vld [vmem:[#allocation2] sm:$0xf]  ;;  %v59_v8 = vunpack.c.0.s8 %v58_v6  ;;  %s188_s0 = smov [#allocation5]  }
  0x14   :  { %v50_v2 = vshrl.u32 %v49_v0, 7  ;;  %v52_v3 = vand.u32 127, %v49_v0  ;;  %v67_v9 = vmul.f32 %v60_v7, %v60_v7  ;;  %v69_v10 = vsub.f32 2.0, %v60_v7  ;;  %s123_s1 = sshll.u32 %s188_s0, 4  ;;  %s124_s1 = int_to_ptr.vmem [resolvable:$true] %s123_s1 }
  0x15   :  { %vm61_vm2 = vcmp.eq.s32.totalorder %v59_v8, 0  ;;  %vm63_vm3 = vcmp.eq.s32.totalorder %v59_v8, 1  ;;  %vm65_vm4 = vcmp.eq.s32.totalorder %v59_v8, 2  ;;  %s160_s23 = scalar_lea.vmem %s124_s1, 64  ;;  %p165_p9 = scmp.lt.s32.totalorder %s124_s1, %s124_s1 }
  0x16   :  { %v53_v4 = vmul.u32 128, %v50_v2  ;;  %v70_v11 = vmax.f32 %v69_v10, 0.0  ;;  %p161_p8 = scmp.ne.s32.totalorder %s124_s1, %s160_s23  ;;  %p166_p10 = scmp.lt.s32.totalorder %s160_s23, %s160_s23 }
  0x18   :  { %v56_v5 = vadd.s32 %v53_v4, %v52_v3  ;;  %v71_v14 = vmul.f32 %v70_v11, %v70_v11  ;;  %p167_p11 = por %p166_p10, %p165_p9 }
  0x1a   :  { %vm57_vm0 = vcmp.lt.s32.totalorder %v56_v5, 512  ;;  %v74_v40 = vld [vmem:[#allocation5] sm:$0x1]  ;;  %v97_v42 = vld [vmem:[#allocation5 + $0x2] sm:$0x1]  ;;  %p168_p12 = pnand %p167_p11, %p161_p8 }
  0x1b   :  { %vm62_vm5 = vmand %vm57_vm0, %vm61_vm2  ;;  %v86_v45 = vld [vmem:[#allocation5 + $0x1] sm:$0x1]  ;;  %v107_v51 = vld [vmem:[#allocation5 + $0x3] sm:$0x1] }
  0x1c   :  { %vm219_vm6 = vmand %vm57_vm0, %vm63_vm3  ;;  %v68_v13 = vsel %vm62_vm5, %v67_v9, 0.0  ;;  %v75_v15 = vsel %vm62_vm5, 1.0, %v187_v1 }
  0x1d   :  { %vm66_vm7 = vmand %vm57_vm0, %vm65_vm4  ;;  %v77_v16 = vsel %vm76_vm1, %v75_v15, 0.0  ;;  %v87_v17 = vsel %vm219_vm6, 1.0, %v187_v1  ;;  %v98_v18 = vsel %vm76_vm1, %v68_v13, 0.0 }
  0x1e   :  { %v72_v19 = vsel %vm66_vm7, -508.0, %v187_v1  ;;  %v78_v20 = vrot.slane %v77_v16, 4  ;;  %v88_v21 = vsel %vm76_vm1, %v87_v17, 0.0  ;;  %v99_v22 = vrot.slane %v98_v18, 4 }
  0x1f   :  { %v73_v23 = vsel %vm219_vm6, %v71_v14, %v72_v19  ;;  %v89_v24 = vrot.slane %v88_v21, 4 }
  0x20   :  { %v79_v25 = vadd.f32 %v78_v20, %v77_v16  ;;  %v108_v26 = vsel %vm76_vm1, %v73_v23, 0.0  ;;  %v100_v27 = vadd.f32 %v99_v22, %v98_v18 }
  0x21   :  { %v90_v28 = vadd.f32 %v89_v24, %v88_v21  ;;  %v109_v29 = vrot.slane %v108_v26, 4 }
  0x22   :  { %v80_v30 = vrot.slane %v79_v25, 2  ;;  %v101_v31 = vrot.slane %v100_v27, 2 }
  0x23   :  { %v91_v32 = vrot.slane %v90_v28, 2  ;;  %v110_v33 = vadd.f32 %v109_v29, %v108_v26 }
  0x24   :  { %v81_v34 = vadd.f32 %v80_v30, %v79_v25  ;;  %v102_v35 = vadd.f32 %v101_v31, %v100_v27 }
  0x25   :  { %v92_v36 = vadd.f32 %v91_v32, %v90_v28  ;;  %v111_v37 = vrot.slane %v110_v33, 2 }
  0x26   :  { %v82_v38 = vrot.slane %v81_v34, 1  ;;  %v103_v39 = vrot.slane %v102_v35, 1 }
  0x27   :  { %v93_v41 = vrot.slane %v92_v36, 1  ;;  %v112_v43 = vadd.f32 %v111_v37, %v110_v33 }
  0x28   :  { %v83_v44 = vadd.f32 %v82_v38, %v81_v34  ;;  %v104_v46 = vadd.f32 %v103_v39, %v102_v35 }
  0x29   :  { %v94_v47 = vadd.f32 %v93_v41, %v92_v36  ;;  %v113_v48 = vrot.slane %v112_v43, 1 }
  0x2a   :  { %v84_v49 = vadd.f32 %v83_v44, %v74_v40  ;;  %v105_v50 = vadd.f32 %v104_v46, %v97_v42 }
  0x2b   :  { %v95_v52 = vadd.f32 %v94_v47, %v86_v45  ;;  %v114_v53 = vadd.f32 %v113_v48, %v112_v43 }
  0x2c   :  { %85 = vst [vmem:[#allocation5] sm:$0x1] %v84_v49  ;;  %106 = vst [vmem:[#allocation5 + $0x2] sm:$0x1] %v105_v50 }
  0x2d   :  { %96 = vst [vmem:[#allocation5 + $0x1] sm:$0x1] %v95_v52  ;;  %v115_v54 = vadd.f32 %v114_v53, %v107_v51 }
  0x2f   :  { %116 = vst [vmem:[#allocation5 + $0x3] sm:$0x1] %v115_v54 }
  0x30   :  { %171 = shalt.err (!%p168_p12)
}
  0x31   :  { %s172_s26 = scalar_lea.hbm %s245_s2, 64 }
  0x32   :  { %p173_p13 = scmp.ne.s32.totalorder %s245_s2, %s172_s26  ;;  %p176_p0 = scmp.lt.u32.totalorder %s172_s26, %s245_s2 }
  0x34   :  { %p178_p1 = pnand %p176_p0, %p173_p13 }
  0x36   :  { %181 = shalt.err (!%p178_p1)
}
  0x37   :  { %126 = dma.vmem_to_hbm [thread:$0]  %s124_s1, 64, %s245_s2, [#allocation4]  }
  0x38   :  { %184 = dma.done.wait [#allocation4], 64  }
  0x39   :  { %185 = vsyncadd [#allocation4], 4294967232 }
  0x3a   :  { %130 = vsyncpa [#allocation3], 1 }
  0x3b   :  { %131 = vsyncpa [#allocation4], 1 }

</bundles_post_ra>
